<compile_context>
chip_gen: v7x
topology: tpu7x:2x2x1
jax: 0.10.0
libtpu: 0.0.40
codegen_flags: <defaults>
</compile_context>

<pallas_src>
import jax
import jax.numpy as jnp
import numpy as np
from jax.experimental import pallas as pl
from jax.experimental.pallas import tpu as pltpu

EPS = 1e-5
N_OPS = 4


def _round_up(x, m):
    return (x + m - 1) // m * m


def _ceil_div(a, b):
    return -(-a // b)


def _pick_tile(C, M, block_m, stream_bytes, cache_bytes):
    """Largest lane-tile TM (multiple of 128) whose pass-1 working set fits VMEM."""
    try:
        vmem_cap = int(pltpu.get_tpu_info().vmem_capacity_bytes)
    except Exception:
        vmem_cap = 64 * 1024 * 1024                     # conservative: v7x per-TC VMEM
    vmem_limit = int(min(vmem_cap * 3 // 4, 96 * 1024 * 1024))
    # pass-1 per-lane bytes: double-buffered patches/hw inputs + cache output,
    # plus ~8 live f32 (C, .) temporaries inside the kernel body
    per_lane = 2 * (9 * C * stream_bytes + 2 * 4 + 3 * C * cache_bytes) + 8 * C * 4
    resident = 2 * 9 * C * C * stream_bytes + 4 * C * 8 * 4 + (1 << 20)
    tm_cap = max(128, (vmem_limit - resident) // per_lane // 128 * 128)
    TM = _round_up(min(block_m, max(M, 1)), 128)
    TM = max(128, min(TM, tm_cap))
    return TM, vmem_limit


def _make_kernels(H, W, cache_dtype):
    """Build the two kernels for one problem shape (static closure params)."""

    def _tap_ops(patches_ref, w_ref, h_idx, w_idx):
        """avg/max pool (3x3, pad 1, count_include_pad=False) + ReLU-conv3x3.

        patches_ref : (9, C, TM) ref, tap k = 3*dh + dw, out-of-image taps are 0.
        w_ref       : (9, C, C) ref (tap-major conv weights).
        h_idx/w_idx : (1, TM) int32 spatial coordinates of each column.
        """
        # tap validity: 4 compares per tile total (center tap always valid)
        vh = ((h_idx >= 1), None, (h_idx < H - 1))
        vw = ((w_idx >= 1), None, (w_idx < W - 1))
        cnt = ((vh[0].astype(jnp.float32) + vh[2].astype(jnp.float32) + 1.0) *
               (vw[0].astype(jnp.float32) + vw[2].astype(jnp.float32) + 1.0))
        inv_cnt = 1.0 / cnt                                 # (1, TM), exact

        center_raw = patches_ref[4]                         # (C, TM) stream dtype
        center = center_raw.astype(jnp.float32)
        s = center
        mx = center
        conv = jnp.dot(w_ref[4], jnp.maximum(center_raw, 0),
                       preferred_element_type=jnp.float32)  # (C, TM) f32
        for k in range(9):
            if k == 4:
                continue
            tap_raw = patches_ref[k]                        # one tap live at a time
            tap = tap_raw.astype(jnp.float32)
            a_, b_ = vh[k // 3], vw[k % 3]
            valid = a_ & b_ if (a_ is not None and b_ is not None) else \
                (a_ if b_ is None else b_)                  # (1, TM) bool
            s = s + tap                                     # invalid taps already 0
            mx = jnp.maximum(mx, jnp.where(valid, tap, -jnp.inf))
            conv = conv + jnp.dot(w_ref[k], jnp.maximum(tap_raw, 0),
                                  preferred_element_type=jnp.float32)
        return s * inv_cnt, mx, conv

    def stats_kernel(patches_ref, hw_ref, w_ref, cache_ref, stats_ref, acc_ref):
        """Pass 1: compute avg/max/conv, cache them, accumulate BN sum/sumsq."""
        j = pl.program_id(1)

        @pl.when(j == 0)
        def _():
            acc_ref[...] = jnp.zeros_like(acc_ref)

        hw = hw_ref[...]                                    # (2, TM) int32
        avg, mx, conv = _tap_ops(patches_ref, w_ref, hw[0:1, :], hw[1:2, :])

        # round to the cache dtype FIRST so the statistics describe exactly the
        # values pass 2 will normalize (bf16-consistent BatchNorm)
        avg_c = avg.astype(cache_dtype)
        mx_c = mx.astype(cache_dtype)
        conv_c = conv.astype(cache_dtype)
        cache_ref[0] = avg_c
        cache_ref[1] = mx_c
        cache_ref[2] = conv_c

        # Padded columns (m >= M) hold zeros in every tap with h=w=0, so all
        # three ops are exactly 0 there -> no column mask needed for the stats.
        def _sums(y):
            yf = y.astype(jnp.float32)
            return (jnp.sum(yf, axis=1, keepdims=True),
                    jnp.sum(yf * yf, axis=1, keepdims=True))

        sa, qa = _sums(avg_c)
        sm, qm = _sums(mx_c)
        sc, qc = _sums(conv_c)
        zero = jnp.zeros_like(sa)
        # TODO(synk): E[x^2]-E[x]^2 in plain f32 can cancel for very large M.
        acc_ref[...] += jnp.concatenate([sa, qa, sm, qm, sc, qc, zero, zero],
                                        axis=1)

        @pl.when(j == pl.num_programs(1) - 1)
        def _():
            stats_ref[0] = acc_ref[...]

    def mix_kernel(coef_ref, xc_ref, cache_ref, out_ref):
        """Pass 2: pure per-channel FMA over {x (center tap), cached ops, coef}."""
        coef = coef_ref[...]                                # (C, 8) f32
        x = xc_ref[0].astype(jnp.float32)                   # center tap == x
        avg = cache_ref[0].astype(jnp.float32)
        mx = cache_ref[1].astype(jnp.float32)
        conv = cache_ref[2].astype(jnp.float32)
        # out = a0*x + (a1/std1)*avg + (a2/std2)*max + (a3/std3)*conv + shift
        acc = coef[:, 0:1] * x + coef[:, 4:5]
        acc = acc + coef[:, 1:2] * avg
        acc = acc + coef[:, 2:3] * mx
        acc = acc + coef[:, 3:4] * conv
        out_ref[...] = acc.astype(out_ref.dtype)

    return stats_kernel, mix_kernel


def mixed_op_forward(x_nchw, alphas, conv_w, *, block_m=2048,
                     stream_dtype=jnp.bfloat16):
    """MixedOp forward. x: (N,C,H,W), alphas: (N_OPS,), conv_w: (C,C,3,3)."""
    N, C, H, W = map(int, x_nchw.shape)
    M = N * H * W
    assert int(alphas.shape[-1]) == N_OPS

    cache_dtype = stream_dtype
    sb = jnp.dtype(stream_dtype).itemsize
    cb = jnp.dtype(cache_dtype).itemsize

    TM, vmem_limit = _pick_tile(C, M, block_m, sb, cb)
    num_tiles = _ceil_div(M, TM)
    P = 2 if num_tiles >= 2 else 1          # 2 partial-stats shards (v7x 2nd TC)
    T2 = _ceil_div(num_tiles, P)
    num_tiles = P * T2
    Mp = num_tiles * TM
    pad = Mp - M

    x32 = x_nchw.astype(jnp.float32)

    # ---- lane-dense layouts: channels in sublanes, M = N*H*W in lanes -------
    xp = jnp.pad(x32, ((0, 0), (0, 0), (1, 1), (1, 1)))
    taps = [jnp.transpose(xp[:, :, dh:dh + H, dw:dw + W], (1, 0, 2, 3)).reshape(C, M)
            for dh in range(3) for dw in range(3)]
    patches = jnp.stack(taps, axis=0)                       # (9, C, M); tap 4 == x

    m_idx = jnp.arange(M, dtype=jnp.int32)
    hw = jnp.stack([(m_idx // W) % H, m_idx % W], axis=0)   # (2, M) int32

    patches = jnp.pad(patches, ((0, 0), (0, 0), (0, pad))).astype(stream_dtype)
    hw = jnp.pad(hw, ((0, 0), (0, pad)))

    # conv weight (Cout, Cin, 3, 3) -> (9, Cout, Cin), tap-major
    w_t = jnp.transpose(conv_w.astype(jnp.float32), (2, 3, 0, 1)).reshape(9, C, C)
    w_t = w_t.astype(stream_dtype)

    stats_kernel, mix_kernel = _make_kernels(H, W, cache_dtype)
    cparams_acc = pltpu.CompilerParams(
        dimension_semantics=("parallel", "arbitrary"),
        vmem_limit_bytes=vmem_limit)
    cparams_par = pltpu.CompilerParams(
        dimension_semantics=("parallel",),
        vmem_limit_bytes=vmem_limit)

    # ---- pass 1: op outputs cached to HBM + global BN statistics ------------
    cache, stats_p = pl.pallas_call(
        stats_kernel,
        out_shape=(jax.ShapeDtypeStruct((3, C, Mp), cache_dtype),
                   jax.ShapeDtypeStruct((P, C, 8), jnp.float32)),
        grid=(P, T2),
        in_specs=[
            pl.BlockSpec((9, C, TM), lambda p, j: (0, 0, p * T2 + j)),
            pl.BlockSpec((2, TM), lambda p, j: (0, p * T2 + j)),
            pl.BlockSpec((9, C, C), lambda p, j: (0, 0, 0)),   # weight: VMEM resident
        ],
        out_specs=[
            pl.BlockSpec((3, C, TM), lambda p, j: (0, 0, p * T2 + j)),
            pl.BlockSpec((1, C, 8), lambda p, j: (p, 0, 0)),
        ],
        scratch_shapes=[pltpu.VMEM((C, 8), jnp.float32)],
        compiler_params=cparams_acc,
    )(patches, hw, w_t)
    stats = jnp.sum(stats_p, axis=0)                        # (C, 8)

    # fold softmax(alphas)*N_OPS and the three BatchNorms into per-channel
    # scale + shift coefficients (tiny XLA ops on a (C, 8) array)
    a = jax.nn.softmax(alphas.astype(jnp.float32), axis=-1) * float(N_OPS)
    mean_avg = stats[:, 0] / M
    var_avg = jnp.maximum(stats[:, 1] / M - mean_avg ** 2, 0.0)
    mean_max = stats[:, 2] / M
    var_max = jnp.maximum(stats[:, 3] / M - mean_max ** 2, 0.0)
    mean_cnv = stats[:, 4] / M
    var_cnv = jnp.maximum(stats[:, 5] / M - mean_cnv ** 2, 0.0)
    c_avg = a[1] * jax.lax.rsqrt(var_avg + EPS)
    c_max = a[2] * jax.lax.rsqrt(var_max + EPS)
    c_cnv = a[3] * jax.lax.rsqrt(var_cnv + EPS)
    shift = -(c_avg * mean_avg + c_max * mean_max + c_cnv * mean_cnv)
    zero = jnp.zeros((C,), jnp.float32)
    coef = jnp.stack([jnp.full((C,), a[0]), c_avg, c_max, c_cnv, shift,
                      zero, zero, zero], axis=1)            # (C, 8) f32

    # ---- pass 2: per-channel FMA mix, tiled over M ("parallel" -> megacore) -
    out_t = pl.pallas_call(
        mix_kernel,
        out_shape=jax.ShapeDtypeStruct((C, Mp), jnp.float32),
        grid=(num_tiles,),
        in_specs=[
            pl.BlockSpec((C, 8), lambda i: (0, 0)),          # coef: VMEM resident
            pl.BlockSpec((1, C, TM), lambda i: (4, 0, i)),   # center tap of patches == x
            pl.BlockSpec((3, C, TM), lambda i: (0, 0, i)),   # cached avg/max/conv
        ],
        out_specs=pl.BlockSpec((C, TM), lambda i: (0, i)),   # lane-dense output
        compiler_params=cparams_par,
    )(coef, patches, cache)

    out = out_t[:, :M].reshape(C, N, H, W)
    return jnp.transpose(out, (1, 0, 2, 3))                  # back to NCHW


def mixed_op_reference(x, alphas, conv_w):
    """Pure-JAX reference of the same MixedOp forward (NCHW)."""
    a = jax.nn.softmax(alphas.astype(jnp.float32), axis=-1)
    x = x.astype(jnp.float32)
    pad = [(0, 0), (0, 0), (1, 1), (1, 1)]

    def bn(y):
        mean = jnp.mean(y, axis=(0, 2, 3), keepdims=True)
        var = jnp.mean((y - mean) ** 2, axis=(0, 2, 3), keepdims=True)
        return (y - mean) * jax.lax.rsqrt(var + EPS)

    o0 = x
    win_sum = jax.lax.reduce_window(x, 0.0, jax.lax.add, (1, 1, 3, 3), (1, 1, 1, 1), pad)
    win_cnt = jax.lax.reduce_window(jnp.ones_like(x[:1, :1]), 0.0, jax.lax.add,
                                    (1, 1, 3, 3), (1, 1, 1, 1), pad)
    o1 = bn(win_sum / win_cnt)
    o2 = bn(jax.lax.reduce_window(x, -jnp.inf, jax.lax.max, (1, 1, 3, 3), (1, 1, 1, 1), pad))
    o3 = bn(jax.lax.conv_general_dilated(jax.nn.relu(x), conv_w.astype(jnp.float32),
                                         (1, 1), [(1, 1), (1, 1)],
                                         dimension_numbers=('NCHW', 'OIHW', 'NCHW')))
    return float(N_OPS) * (a[0] * o0 + a[1] * o1 + a[2] * o2 + a[3] * o3)


if __name__ == "__main__":
    key = jax.random.PRNGKey(0)
    kx, kw, ka = jax.random.split(key, 3)
    N, C, H, W = 2, 4, 16, 16
    x = jax.random.normal(kx, (N, C, H, W), jnp.float32)
    conv_w = jax.random.normal(kw, (C, C, 3, 3), jnp.float32) * 0.1
    alphas = jax.random.normal(ka, (N_OPS,), jnp.float32)

    ref = mixed_op_reference(x, alphas, conv_w)

    # f32 streams, TM=128 -> 4 tiles in 2 parallel stats shards (multi-step BN)
    out = jax.block_until_ready(
        mixed_op_forward(x, alphas, conv_w, block_m=128, stream_dtype=jnp.float32))
    np.testing.assert_allclose(np.asarray(out), np.asarray(ref), rtol=1e-3, atol=1e-3)

    # ragged M (padding-column path): N*H*W not a multiple of the tile width
    x2 = jax.random.normal(kx, (2, 4, 13, 11), jnp.float32)
    ref2 = mixed_op_reference(x2, alphas, conv_w)
    out2 = jax.block_until_ready(
        mixed_op_forward(x2, alphas, conv_w, block_m=256, stream_dtype=jnp.float32))
    np.testing.assert_allclose(np.asarray(out2), np.asarray(ref2), rtol=1e-3, atol=1e-3)

    # default bf16 streaming: bf16 HBM traffic + bf16 op-output cache,
    # f32 MXU accumulation and f32 BN statistics (self-consistent under rounding)
    out_bf = jax.block_until_ready(mixed_op_forward(x, alphas, conv_w))
    np.testing.assert_allclose(np.asarray(out_bf), np.asarray(ref), rtol=1e-1, atol=2e-1)

    print("KERNEL_OK")
</pallas_src>

<mosaic_0001>
module attributes {stable_mosaic.version = 11 : i64} {
  func.func @stats_kernel(%arg0: i32, %arg1: i32, %arg2: memref<9x4x128xf32, #tpu.memory_space<vmem>>, %arg3: memref<2x128xi32, #tpu.memory_space<vmem>>, %arg4: memref<9x4x4xf32, #tpu.memory_space<vmem>>, %arg5: memref<3x4x128xf32, #tpu.memory_space<vmem>>, %arg6: memref<1x4x8xf32, #tpu.memory_space<vmem>>, %arg7: memref<4x8xf32, #tpu.memory_space<vmem>>) attributes {dimension_semantics = [#tpu.dimension_semantics<parallel>, #tpu.dimension_semantics<arbitrary>], iteration_bounds = array<i64: 2, 2>, scalar_prefetch = 0 : i64, scratch_operands = 1 : i64, tpu.core_type = #tpu.core_type<tc>, window_params = [{transform_indices = @transform_0, window_bounds = array<i64: 9, 4, 128>}, {transform_indices = @transform_1, window_bounds = array<i64: 2, 128>}, {pipeline_mode = #tpu.pipeline_mode<synchronous>, transform_indices = @transform_2, window_bounds = array<i64: 9, 4, 4>}, {transform_indices = @transform_3, window_bounds = array<i64: 3, 4, 128>}, {transform_indices = @transform_4, window_bounds = array<i64: 1, 4, 8>}]} {
    %c0_i32 = arith.constant 0 : i32
    %0 = arith.cmpi eq, %arg1, %c0_i32 : i32
    %1 = arith.extui %0 : i1 to i32
    %c0_i32_0 = arith.constant 0 : i32
    %2 = arith.cmpi ne, %1, %c0_i32_0 : i32
    scf.if %2 {
      %cst_100 = arith.constant 0.000000e+00 : f32
      %188 = vector.broadcast %cst_100 : f32 to vector<4x8xf32>
      %c0_101 = arith.constant 0 : index
      %c0_102 = arith.constant 0 : index
      %189 = vector.load %arg7[%c0_101, %c0_102] : memref<4x8xf32, #tpu.memory_space<vmem>>, vector<4x8xf32>
      tpu.vector_store %arg7[%c0_101, %c0_102], %188 {strides = array<i32>} : memref<4x8xf32, #tpu.memory_space<vmem>>, vector<4x8xf32>,
    } else {
    }
    %c0 = arith.constant 0 : index
    %c0_1 = arith.constant 0 : index
    %3 = vector.load %arg3[%c0, %c0_1] : memref<2x128xi32, #tpu.memory_space<vmem>>, vector<2x128xi32>
    %4 = vector.extract_strided_slice %3 {offsets = [0, 0], sizes = [1, 128], strides = [1, 1]} : vector<2x128xi32> to vector<1x128xi32>
    %5 = vector.extract_strided_slice %3 {offsets = [1, 0], sizes = [1, 128], strides = [1, 1]} : vector<2x128xi32> to vector<1x128xi32>
    %c1_i32 = arith.constant 1 : i32
    %6 = vector.broadcast %c1_i32 : i32 to vector<1x128xi32>
    %7 = arith.cmpi sge, %4, %6 : vector<1x128xi32>
    %c15_i32 = arith.constant 15 : i32
    %8 = vector.broadcast %c15_i32 : i32 to vector<1x128xi32>
    %9 = arith.cmpi slt, %4, %8 : vector<1x128xi32>
    %c1_i32_2 = arith.constant 1 : i32
    %10 = vector.broadcast %c1_i32_2 : i32 to vector<1x128xi32>
    %11 = arith.cmpi sge, %5, %10 : vector<1x128xi32>
    %c15_i32_3 = arith.constant 15 : i32
    %12 = vector.broadcast %c15_i32_3 : i32 to vector<1x128xi32>
    %13 = arith.cmpi slt, %5, %12 : vector<1x128xi32>
    %14 = arith.extui %7 : vector<1x128xi1> to vector<1x128xi32>
    %15 = arith.sitofp %14 : vector<1x128xi32> to vector<1x128xf32>
    %16 = arith.extui %9 : vector<1x128xi1> to vector<1x128xi32>
    %17 = arith.sitofp %16 : vector<1x128xi32> to vector<1x128xf32>
    %18 = arith.addf %15, %17 : vector<1x128xf32>
    %cst = arith.constant 1.000000e+00 : f32
    %19 = vector.broadcast %cst : f32 to vector<1x128xf32>
    %20 = arith.addf %18, %19 : vector<1x128xf32>
    %21 = arith.extui %11 : vector<1x128xi1> to vector<1x128xi32>
    %22 = arith.sitofp %21 : vector<1x128xi32> to vector<1x128xf32>
    %23 = arith.extui %13 : vector<1x128xi1> to vector<1x128xi32>
    %24 = arith.sitofp %23 : vector<1x128xi32> to vector<1x128xf32>
    %25 = arith.addf %22, %24 : vector<1x128xf32>
    %cst_4 = arith.constant 1.000000e+00 : f32
    %26 = vector.broadcast %cst_4 : f32 to vector<1x128xf32>
    %27 = arith.addf %25, %26 : vector<1x128xf32>
    %28 = arith.mulf %20, %27 : vector<1x128xf32>
    %cst_5 = arith.constant 1.000000e+00 : f32
    %29 = vector.broadcast %cst_5 : f32 to vector<1x128xf32>
    %30 = arith.divf %29, %28 : vector<1x128xf32>
    %c4 = arith.constant 4 : index
    %c0_6 = arith.constant 0 : index
    %c0_7 = arith.constant 0 : index
    %31 = vector.load %arg2[%c4, %c0_6, %c0_7] : memref<9x4x128xf32, #tpu.memory_space<vmem>>, vector<1x4x128xf32>
    %32 = vector.shape_cast %31 : vector<1x4x128xf32> to vector<4x128xf32>
    %c4_8 = arith.constant 4 : index
    %c0_9 = arith.constant 0 : index
    %c0_10 = arith.constant 0 : index
    %33 = vector.load %arg4[%c4_8, %c0_9, %c0_10] : memref<9x4x4xf32, #tpu.memory_space<vmem>>, vector<1x4x4xf32>
    %34 = vector.shape_cast %33 : vector<1x4x4xf32> to vector<4x4xf32>
    %cst_11 = arith.constant 0.000000e+00 : f32
    %35 = vector.broadcast %cst_11 : f32 to vector<4x128xf32>
    %36 = arith.maximumf %32, %35 : vector<4x128xf32>
    %cst_12 = arith.constant dense<0.000000e+00> : vector<4x128xf32>
    %37 = tpu.matmul %34, %36, %cst_12 {dimension_numbers = #tpu.dot_dimension_numbers<[1], [0], [0], [1], [0, 0, 1, 1], [], []>} : vector<4x4xf32>, vector<4x128xf32>, vector<4x128xf32> -> vector<4x128xf32>
    %c0_13 = arith.constant 0 : index
    %c0_14 = arith.constant 0 : index
    %c0_15 = arith.constant 0 : index
    %38 = vector.load %arg2[%c0_13, %c0_14, %c0_15] : memref<9x4x128xf32, #tpu.memory_space<vmem>>, vector<1x4x128xf32>
    %39 = vector.shape_cast %38 : vector<1x4x128xf32> to vector<4x128xf32>
    %40 = arith.andi %7, %11 : vector<1x128xi1>
    %41 = arith.addf %32, %39 : vector<4x128xf32>
    %cst_16 = arith.constant 0xFF800000 : f32
    %42 = vector.shape_cast %40 : vector<1x128xi1> to vector<1x128xi1>
    %43 = vector.broadcast %42 : vector<1x128xi1> to vector<4x128xi1>
    %44 = vector.broadcast %cst_16 : f32 to vector<4x128xf32>
    %45 = arith.select %43, %39, %44 : vector<4x128xi1>, vector<4x128xf32>
    %46 = arith.maximumf %32, %45 : vector<4x128xf32>
    %c0_17 = arith.constant 0 : index
    %c0_18 = arith.constant 0 : index
    %c0_19 = arith.constant 0 : index
    %47 = vector.load %arg4[%c0_17, %c0_18, %c0_19] : memref<9x4x4xf32, #tpu.memory_space<vmem>>, vector<1x4x4xf32>
    %48 = vector.shape_cast %47 : vector<1x4x4xf32> to vector<4x4xf32>
    %cst_20 = arith.constant 0.000000e+00 : f32
    %49 = vector.broadcast %cst_20 : f32 to vector<4x128xf32>
    %50 = arith.maximumf %39, %49 : vector<4x128xf32>
    %cst_21 = arith.constant dense<0.000000e+00> : vector<4x128xf32>
    %51 = tpu.matmul %48, %50, %cst_21 {dimension_numbers = #tpu.dot_dimension_numbers<[1], [0], [0], [1], [0, 0, 1, 1], [], []>} : vector<4x4xf32>, vector<4x128xf32>, vector<4x128xf32> -> vector<4x128xf32>
    %52 = arith.addf %37, %51 : vector<4x128xf32>
    %c1 = arith.constant 1 : index
    %c0_22 = arith.constant 0 : index
    %c0_23 = arith.constant 0 : index
    %53 = vector.load %arg2[%c1, %c0_22, %c0_23] : memref<9x4x128xf32, #tpu.memory_space<vmem>>, vector<1x4x128xf32>
    %54 = vector.shape_cast %53 : vector<1x4x128xf32> to vector<4x128xf32>
    %55 = arith.addf %41, %54 : vector<4x128xf32>
    %cst_24 = arith.constant 0xFF800000 : f32
    %56 = vector.shape_cast %7 : vector<1x128xi1> to vector<1x128xi1>
    %57 = vector.broadcast %56 : vector<1x128xi1> to vector<4x128xi1>
    %58 = vector.broadcast %cst_24 : f32 to vector<4x128xf32>
    %59 = arith.select %57, %54, %58 : vector<4x128xi1>, vector<4x128xf32>
    %60 = arith.maximumf %46, %59 : vector<4x128xf32>
    %c1_25 = arith.constant 1 : index
    %c0_26 = arith.constant 0 : index
    %c0_27 = arith.constant 0 : index
    %61 = vector.load %arg4[%c1_25, %c0_26, %c0_27] : memref<9x4x4xf32, #tpu.memory_space<vmem>>, vector<1x4x4xf32>
    %62 = vector.shape_cast %61 : vector<1x4x4xf32> to vector<4x4xf32>
    %cst_28 = arith.constant 0.000000e+00 : f32
    %63 = vector.broadcast %cst_28 : f32 to vector<4x128xf32>
    %64 = arith.maximumf %54, %63 : vector<4x128xf32>
    %cst_29 = arith.constant dense<0.000000e+00> : vector<4x128xf32>
    %65 = tpu.matmul %62, %64, %cst_29 {dimension_numbers = #tpu.dot_dimension_numbers<[1], [0], [0], [1], [0, 0, 1, 1], [], []>} : vector<4x4xf32>, vector<4x128xf32>, vector<4x128xf32> -> vector<4x128xf32>
    %66 = arith.addf %52, %65 : vector<4x128xf32>
    %c2 = arith.constant 2 : index
    %c0_30 = arith.constant 0 : index
    %c0_31 = arith.constant 0 : index
    %67 = vector.load %arg2[%c2, %c0_30, %c0_31] : memref<9x4x128xf32, #tpu.memory_space<vmem>>, vector<1x4x128xf32>
    %68 = vector.shape_cast %67 : vector<1x4x128xf32> to vector<4x128xf32>
    %69 = arith.andi %7, %13 : vector<1x128xi1>
    %70 = arith.addf %55, %68 : vector<4x128xf32>
    %cst_32 = arith.constant 0xFF800000 : f32
    %71 = vector.shape_cast %69 : vector<1x128xi1> to vector<1x128xi1>
    %72 = vector.broadcast %71 : vector<1x128xi1> to vector<4x128xi1>
    %73 = vector.broadcast %cst_32 : f32 to vector<4x128xf32>
    %74 = arith.select %72, %68, %73 : vector<4x128xi1>, vector<4x128xf32>
    %75 = arith.maximumf %60, %74 : vector<4x128xf32>
    %c2_33 = arith.constant 2 : index
    %c0_34 = arith.constant 0 : index
    %c0_35 = arith.constant 0 : index
    %76 = vector.load %arg4[%c2_33, %c0_34, %c0_35] : memref<9x4x4xf32, #tpu.memory_space<vmem>>, vector<1x4x4xf32>
    %77 = vector.shape_cast %76 : vector<1x4x4xf32> to vector<4x4xf32>
    %cst_36 = arith.constant 0.000000e+00 : f32
    %78 = vector.broadcast %cst_36 : f32 to vector<4x128xf32>
    %79 = arith.maximumf %68, %78 : vector<4x128xf32>
    %cst_37 = arith.constant dense<0.000000e+00> : vector<4x128xf32>
    %80 = tpu.matmul %77, %79, %cst_37 {dimension_numbers = #tpu.dot_dimension_numbers<[1], [0], [0], [1], [0, 0, 1, 1], [], []>} : vector<4x4xf32>, vector<4x128xf32>, vector<4x128xf32> -> vector<4x128xf32>
    %81 = arith.addf %66, %80 : vector<4x128xf32>
    %c3 = arith.constant 3 : index
    %c0_38 = arith.constant 0 : index
    %c0_39 = arith.constant 0 : index
    %82 = vector.load %arg2[%c3, %c0_38, %c0_39] : memref<9x4x128xf32, #tpu.memory_space<vmem>>, vector<1x4x128xf32>
    %83 = vector.shape_cast %82 : vector<1x4x128xf32> to vector<4x128xf32>
    %84 = arith.addf %70, %83 : vector<4x128xf32>
    %cst_40 = arith.constant 0xFF800000 : f32
    %85 = vector.shape_cast %11 : vector<1x128xi1> to vector<1x128xi1>
    %86 = vector.broadcast %85 : vector<1x128xi1> to vector<4x128xi1>
    %87 = vector.broadcast %cst_40 : f32 to vector<4x128xf32>
    %88 = arith.select %86, %83, %87 : vector<4x128xi1>, vector<4x128xf32>
    %89 = arith.maximumf %75, %88 : vector<4x128xf32>
    %c3_41 = arith.constant 3 : index
    %c0_42 = arith.constant 0 : index
    %c0_43 = arith.constant 0 : index
    %90 = vector.load %arg4[%c3_41, %c0_42, %c0_43] : memref<9x4x4xf32, #tpu.memory_space<vmem>>, vector<1x4x4xf32>
    %91 = vector.shape_cast %90 : vector<1x4x4xf32> to vector<4x4xf32>
    %cst_44 = arith.constant 0.000000e+00 : f32
    %92 = vector.broadcast %cst_44 : f32 to vector<4x128xf32>
    %93 = arith.maximumf %83, %92 : vector<4x128xf32>
    %cst_45 = arith.constant dense<0.000000e+00> : vector<4x128xf32>
    %94 = tpu.matmul %91, %93, %cst_45 {dimension_numbers = #tpu.dot_dimension_numbers<[1], [0], [0], [1], [0, 0, 1, 1], [], []>} : vector<4x4xf32>, vector<4x128xf32>, vector<4x128xf32> -> vector<4x128xf32>
    %95 = arith.addf %81, %94 : vector<4x128xf32>
    %c5 = arith.constant 5 : index
    %c0_46 = arith.constant 0 : index
    %c0_47 = arith.constant 0 : index
    %96 = vector.load %arg2[%c5, %c0_46, %c0_47] : memref<9x4x128xf32, #tpu.memory_space<vmem>>, vector<1x4x128xf32>
    %97 = vector.shape_cast %96 : vector<1x4x128xf32> to vector<4x128xf32>
    %98 = arith.addf %84, %97 : vector<4x128xf32>
    %cst_48 = arith.constant 0xFF800000 : f32
    %99 = vector.shape_cast %13 : vector<1x128xi1> to vector<1x128xi1>
    %100 = vector.broadcast %99 : vector<1x128xi1> to vector<4x128xi1>
    %101 = vector.broadcast %cst_48 : f32 to vector<4x128xf32>
    %102 = arith.select %100, %97, %101 : vector<4x128xi1>, vector<4x128xf32>
    %103 = arith.maximumf %89, %102 : vector<4x128xf32>
    %c5_49 = arith.constant 5 : index
    %c0_50 = arith.constant 0 : index
    %c0_51 = arith.constant 0 : index
    %104 = vector.load %arg4[%c5_49, %c0_50, %c0_51] : memref<9x4x4xf32, #tpu.memory_space<vmem>>, vector<1x4x4xf32>
    %105 = vector.shape_cast %104 : vector<1x4x4xf32> to vector<4x4xf32>
    %cst_52 = arith.constant 0.000000e+00 : f32
    %106 = vector.broadcast %cst_52 : f32 to vector<4x128xf32>
    %107 = arith.maximumf %97, %106 : vector<4x128xf32>
    %cst_53 = arith.constant dense<0.000000e+00> : vector<4x128xf32>
    %108 = tpu.matmul %105, %107, %cst_53 {dimension_numbers = #tpu.dot_dimension_numbers<[1], [0], [0], [1], [0, 0, 1, 1], [], []>} : vector<4x4xf32>, vector<4x128xf32>, vector<4x128xf32> -> vector<4x128xf32>
    %109 = arith.addf %95, %108 : vector<4x128xf32>
    %c6 = arith.constant 6 : index
    %c0_54 = arith.constant 0 : index
    %c0_55 = arith.constant 0 : index
    %110 = vector.load %arg2[%c6, %c0_54, %c0_55] : memref<9x4x128xf32, #tpu.memory_space<vmem>>, vector<1x4x128xf32>
    %111 = vector.shape_cast %110 : vector<1x4x128xf32> to vector<4x128xf32>
    %112 = arith.andi %9, %11 : vector<1x128xi1>
    %113 = arith.addf %98, %111 : vector<4x128xf32>
    %cst_56 = arith.constant 0xFF800000 : f32
    %114 = vector.shape_cast %112 : vector<1x128xi1> to vector<1x128xi1>
    %115 = vector.broadcast %114 : vector<1x128xi1> to vector<4x128xi1>
    %116 = vector.broadcast %cst_56 : f32 to vector<4x128xf32>
    %117 = arith.select %115, %111, %116 : vector<4x128xi1>, vector<4x128xf32>
    %118 = arith.maximumf %103, %117 : vector<4x128xf32>
    %c6_57 = arith.constant 6 : index
    %c0_58 = arith.constant 0 : index
    %c0_59 = arith.constant 0 : index
    %119 = vector.load %arg4[%c6_57, %c0_58, %c0_59] : memref<9x4x4xf32, #tpu.memory_space<vmem>>, vector<1x4x4xf32>
    %120 = vector.shape_cast %119 : vector<1x4x4xf32> to vector<4x4xf32>
    %cst_60 = arith.constant 0.000000e+00 : f32
    %121 = vector.broadcast %cst_60 : f32 to vector<4x128xf32>
    %122 = arith.maximumf %111, %121 : vector<4x128xf32>
    %cst_61 = arith.constant dense<0.000000e+00> : vector<4x128xf32>
    %123 = tpu.matmul %120, %122, %cst_61 {dimension_numbers = #tpu.dot_dimension_numbers<[1], [0], [0], [1], [0, 0, 1, 1], [], []>} : vector<4x4xf32>, vector<4x128xf32>, vector<4x128xf32> -> vector<4x128xf32>
    %124 = arith.addf %109, %123 : vector<4x128xf32>
    %c7 = arith.constant 7 : index
    %c0_62 = arith.constant 0 : index
    %c0_63 = arith.constant 0 : index
    %125 = vector.load %arg2[%c7, %c0_62, %c0_63] : memref<9x4x128xf32, #tpu.memory_space<vmem>>, vector<1x4x128xf32>
    %126 = vector.shape_cast %125 : vector<1x4x128xf32> to vector<4x128xf32>
    %127 = arith.addf %113, %126 : vector<4x128xf32>
    %cst_64 = arith.constant 0xFF800000 : f32
    %128 = vector.shape_cast %9 : vector<1x128xi1> to vector<1x128xi1>
    %129 = vector.broadcast %128 : vector<1x128xi1> to vector<4x128xi1>
    %130 = vector.broadcast %cst_64 : f32 to vector<4x128xf32>
    %131 = arith.select %129, %126, %130 : vector<4x128xi1>, vector<4x128xf32>
    %132 = arith.maximumf %118, %131 : vector<4x128xf32>
    %c7_65 = arith.constant 7 : index
    %c0_66 = arith.constant 0 : index
    %c0_67 = arith.constant 0 : index
    %133 = vector.load %arg4[%c7_65, %c0_66, %c0_67] : memref<9x4x4xf32, #tpu.memory_space<vmem>>, vector<1x4x4xf32>
    %134 = vector.shape_cast %133 : vector<1x4x4xf32> to vector<4x4xf32>
    %cst_68 = arith.constant 0.000000e+00 : f32
    %135 = vector.broadcast %cst_68 : f32 to vector<4x128xf32>
    %136 = arith.maximumf %126, %135 : vector<4x128xf32>
    %cst_69 = arith.constant dense<0.000000e+00> : vector<4x128xf32>
    %137 = tpu.matmul %134, %136, %cst_69 {dimension_numbers = #tpu.dot_dimension_numbers<[1], [0], [0], [1], [0, 0, 1, 1], [], []>} : vector<4x4xf32>, vector<4x128xf32>, vector<4x128xf32> -> vector<4x128xf32>
    %138 = arith.addf %124, %137 : vector<4x128xf32>
    %c8 = arith.constant 8 : index
    %c0_70 = arith.constant 0 : index
    %c0_71 = arith.constant 0 : index
    %139 = vector.load %arg2[%c8, %c0_70, %c0_71] : memref<9x4x128xf32, #tpu.memory_space<vmem>>, vector<1x4x128xf32>
    %140 = vector.shape_cast %139 : vector<1x4x128xf32> to vector<4x128xf32>
    %141 = arith.andi %9, %13 : vector<1x128xi1>
    %142 = arith.addf %127, %140 : vector<4x128xf32>
    %cst_72 = arith.constant 0xFF800000 : f32
    %143 = vector.shape_cast %141 : vector<1x128xi1> to vector<1x128xi1>
    %144 = vector.broadcast %143 : vector<1x128xi1> to vector<4x128xi1>
    %145 = vector.broadcast %cst_72 : f32 to vector<4x128xf32>
    %146 = arith.select %144, %140, %145 : vector<4x128xi1>, vector<4x128xf32>
    %147 = arith.maximumf %132, %146 : vector<4x128xf32>
    %c8_73 = arith.constant 8 : index
    %c0_74 = arith.constant 0 : index
    %c0_75 = arith.constant 0 : index
    %148 = vector.load %arg4[%c8_73, %c0_74, %c0_75] : memref<9x4x4xf32, #tpu.memory_space<vmem>>, vector<1x4x4xf32>
    %149 = vector.shape_cast %148 : vector<1x4x4xf32> to vector<4x4xf32>
    %cst_76 = arith.constant 0.000000e+00 : f32
    %150 = vector.broadcast %cst_76 : f32 to vector<4x128xf32>
    %151 = arith.maximumf %140, %150 : vector<4x128xf32>
    %cst_77 = arith.constant dense<0.000000e+00> : vector<4x128xf32>
    %152 = tpu.matmul %149, %151, %cst_77 {dimension_numbers = #tpu.dot_dimension_numbers<[1], [0], [0], [1], [0, 0, 1, 1], [], []>} : vector<4x4xf32>, vector<4x128xf32>, vector<4x128xf32> -> vector<4x128xf32>
    %153 = arith.addf %138, %152 : vector<4x128xf32>
    %154 = vector.broadcast %30 : vector<1x128xf32> to vector<4x128xf32>
    %155 = arith.mulf %142, %154 : vector<4x128xf32>
    %c0_78 = arith.constant 0 : index
    %c0_79 = arith.constant 0 : index
    %c0_80 = arith.constant 0 : index
    %156 = vector.load %arg5[%c0_78, %c0_79, %c0_80] : memref<3x4x128xf32, #tpu.memory_space<vmem>>, vector<1x4x128xf32>
    %157 = vector.shape_cast %156 : vector<1x4x128xf32> to vector<4x128xf32>
    %158 = vector.shape_cast %155 : vector<4x128xf32> to vector<1x4x128xf32>
    tpu.vector_store %arg5[%c0_78, %c0_79, %c0_80], %158 {strides = array<i32>} : memref<3x4x128xf32, #tpu.memory_space<vmem>>, vector<1x4x128xf32>,
    %c1_81 = arith.constant 1 : index
    %c0_82 = arith.constant 0 : index
    %c0_83 = arith.constant 0 : index
    %159 = vector.load %arg5[%c1_81, %c0_82, %c0_83] : memref<3x4x128xf32, #tpu.memory_space<vmem>>, vector<1x4x128xf32>
    %160 = vector.shape_cast %159 : vector<1x4x128xf32> to vector<4x128xf32>
    %161 = vector.shape_cast %147 : vector<4x128xf32> to vector<1x4x128xf32>
    tpu.vector_store %arg5[%c1_81, %c0_82, %c0_83], %161 {strides = array<i32>} : memref<3x4x128xf32, #tpu.memory_space<vmem>>, vector<1x4x128xf32>,
    %c2_84 = arith.constant 2 : index
    %c0_85 = arith.constant 0 : index
    %c0_86 = arith.constant 0 : index
    %162 = vector.load %arg5[%c2_84, %c0_85, %c0_86] : memref<3x4x128xf32, #tpu.memory_space<vmem>>, vector<1x4x128xf32>
    %163 = vector.shape_cast %162 : vector<1x4x128xf32> to vector<4x128xf32>
    %164 = vector.shape_cast %153 : vector<4x128xf32> to vector<1x4x128xf32>
    tpu.vector_store %arg5[%c2_84, %c0_85, %c0_86], %164 {strides = array<i32>} : memref<3x4x128xf32, #tpu.memory_space<vmem>>, vector<1x4x128xf32>,
    %cst_87 = arith.constant dense<0.000000e+00> : vector<4xf32>
    %165 = vector.multi_reduction <add>, %155, %cst_87 [1] : vector<4x128xf32> to vector<4xf32>
    %166 = vector.shape_cast %165 : vector<4xf32> to vector<4x1xf32>
    %167 = arith.mulf %155, %155 : vector<4x128xf32>
    %cst_88 = arith.constant dense<0.000000e+00> : vector<4xf32>
    %168 = vector.multi_reduction <add>, %167, %cst_88 [1] : vector<4x128xf32> to vector<4xf32>
    %169 = vector.shape_cast %168 : vector<4xf32> to vector<4x1xf32>
    %cst_89 = arith.constant dense<0.000000e+00> : vector<4xf32>
    %170 = vector.multi_reduction <add>, %147, %cst_89 [1] : vector<4x128xf32> to vector<4xf32>
    %171 = vector.shape_cast %170 : vector<4xf32> to vector<4x1xf32>
    %172 = arith.mulf %147, %147 : vector<4x128xf32>
    %cst_90 = arith.constant dense<0.000000e+00> : vector<4xf32>
    %173 = vector.multi_reduction <add>, %172, %cst_90 [1] : vector<4x128xf32> to vector<4xf32>
    %174 = vector.shape_cast %173 : vector<4xf32> to vector<4x1xf32>
    %cst_91 = arith.constant dense<0.000000e+00> : vector<4xf32>
    %175 = vector.multi_reduction <add>, %153, %cst_91 [1] : vector<4x128xf32> to vector<4xf32>
    %176 = vector.shape_cast %175 : vector<4xf32> to vector<4x1xf32>
    %177 = arith.mulf %153, %153 : vector<4x128xf32>
    %cst_92 = arith.constant dense<0.000000e+00> : vector<4xf32>
    %178 = vector.multi_reduction <add>, %177, %cst_92 [1] : vector<4x128xf32> to vector<4xf32>
    %179 = vector.shape_cast %178 : vector<4xf32> to vector<4x1xf32>
    %cst_93 = arith.constant 0.000000e+00 : f32
    %180 = vector.broadcast %cst_93 : f32 to vector<4x1xf32>
    %c0_94 = arith.constant 0 : index
    %c0_95 = arith.constant 0 : index
    %181 = vector.load %arg7[%c0_94, %c0_95] : memref<4x8xf32, #tpu.memory_space<vmem>>, vector<4x8xf32>
    %182 = tpu.concatenate %166, %169, %171, %174, %176, %179, %180, %180 in 1 : vector<4x1xf32>, vector<4x1xf32>, vector<4x1xf32>, vector<4x1xf32>, vector<4x1xf32>, vector<4x1xf32>, vector<4x1xf32>, vector<4x1xf32> -> vector<4x8xf32>
    %183 = arith.addf %181, %182 : vector<4x8xf32>
    %c0_96 = arith.constant 0 : index
    %c0_97 = arith.constant 0 : index
    %184 = vector.load %arg7[%c0_96, %c0_97] : memref<4x8xf32, #tpu.memory_space<vmem>>, vector<4x8xf32>
    tpu.vector_store %arg7[%c0_96, %c0_97], %183 {strides = array<i32>} : memref<4x8xf32, #tpu.memory_space<vmem>>, vector<4x8xf32>,
    %c1_i32_98 = arith.constant 1 : i32
    %185 = arith.cmpi eq, %arg1, %c1_i32_98 : i32
    %186 = arith.extui %185 : i1 to i32
    %c0_i32_99 = arith.constant 0 : i32
    %187 = arith.cmpi ne, %186, %c0_i32_99 : i32
    scf.if %187 {
      %c0_100 = arith.constant 0 : index
      %c0_101 = arith.constant 0 : index
      %188 = vector.load %arg7[%c0_100, %c0_101] : memref<4x8xf32, #tpu.memory_space<vmem>>, vector<4x8xf32>
      %c0_102 = arith.constant 0 : index
      %c0_103 = arith.constant 0 : index
      %c0_104 = arith.constant 0 : index
      %189 = vector.load %arg6[%c0_102, %c0_103, %c0_104] : memref<1x4x8xf32, #tpu.memory_space<vmem>>, vector<1x4x8xf32>
      %190 = vector.shape_cast %189 : vector<1x4x8xf32> to vector<4x8xf32>
      %191 = vector.shape_cast %188 : vector<4x8xf32> to vector<1x4x8xf32>
      tpu.vector_store %arg6[%c0_102, %c0_103, %c0_104], %191 {strides = array<i32>} : memref<1x4x8xf32, #tpu.memory_space<vmem>>, vector<1x4x8xf32>,
    } else {
    }
    return
  }
  func.func @transform_0(%arg0: i32, %arg1: i32) -> (i32, i32, i32) {
    %c2_i32 = arith.constant 2 : i32
    %0 = arith.muli %arg0, %c2_i32 : i32
    %1 = arith.addi %0, %arg1 : i32
    %c0_i32 = arith.constant 0 : i32
    %c0_i32_0 = arith.constant 0 : i32
    %c0_i32_1 = arith.constant 0 : i32
    return %c0_i32, %c0_i32_0, %1 : i32, i32, i32
  }
  func.func @transform_1(%arg0: i32, %arg1: i32) -> (i32, i32) {
    %c2_i32 = arith.constant 2 : i32
    %0 = arith.muli %arg0, %c2_i32 : i32
    %1 = arith.addi %0, %arg1 : i32
    %c0_i32 = arith.constant 0 : i32
    %c0_i32_0 = arith.constant 0 : i32
    return %c0_i32, %1 : i32, i32
  }
  func.func @transform_2(%arg0: i32, %arg1: i32) -> (i32, i32, i32) {
    %c0_i32 = arith.constant 0 : i32
    %c0_i32_0 = arith.constant 0 : i32
    %c0_i32_1 = arith.constant 0 : i32
    %c0_i32_2 = arith.constant 0 : i32
    return %c0_i32, %c0_i32_0, %c0_i32_1 : i32, i32, i32
  }
  func.func @transform_3(%arg0: i32, %arg1: i32) -> (i32, i32, i32) {
    %c2_i32 = arith.constant 2 : i32
    %0 = arith.muli %arg0, %c2_i32 : i32
    %1 = arith.addi %0, %arg1 : i32
    %c0_i32 = arith.constant 0 : i32
    %c0_i32_0 = arith.constant 0 : i32
    %c0_i32_1 = arith.constant 0 : i32
    return %c0_i32, %c0_i32_0, %1 : i32, i32, i32
  }
  func.func @transform_4(%arg0: i32, %arg1: i32) -> (i32, i32, i32) {
    %c0_i32 = arith.constant 0 : i32
    %c0_i32_0 = arith.constant 0 : i32
    %c0_i32_1 = arith.constant 0 : i32
    return %arg0, %c0_i32, %c0_i32_0 : i32, i32, i32
  }
}

</mosaic_0001>

<bundles_post_ra>
// kernel: tpu_custom_call.1
= control target key start
LH: loop header
LB: loop body
LE: loop exit
PB: predicated region body
PF: predicated region fallthrough
CT: control target
= control target key end

     0   :  { %s2315_s0 = inlined_call_operand.hbm [shape: f32[9,4,512], index: 0, kind: input, shape index: {}]   ;;  %s2316_s1 = inlined_call_operand.vmem [shape: s32[2,512], index: 1, kind: input, shape index: {}]   ;;  %s2317_s2 = inlined_call_operand.vmem [shape: f32[9,4,4], index: 2, kind: input, shape index: {}]   ;;  %s2318_s3 = inlined_call_operand.hbm [shape: f32[3,4,512], index: 3, kind: output, shape index: {0}]   ;;  %s2319_s4 = inlined_call_operand.hbm [shape: f32[2,4,8], index: 4, kind: output, shape index: {1}]  }
   0x1   :  { %2327 = sst [smem:[#allocation18_spill]] %s2315_s0 }
   0x2   :  { %2328 = sst [smem:[#allocation19_spill]] %s2316_s1 }
   0x3   :  { %2329 = sst [smem:[#allocation20_spill]] %s2317_s2 }
   0x4   :  { %2330 = sst [smem:[#allocation21_spill]] %s2318_s3 }
   0x5   :  { %10 = vsyncpa [#allocation4], 0 }
   0x6   :  { %12 = vsyncpa [#allocation4 + $0x1], 0 }
   0x7   :  { %13 = vsyncpa [#allocation5], 0 }
   0x8   :  { %15 = vsyncpa [#allocation5 + $0x1], 0 }
   0x9   :  { %16 = vsyncpa [#allocation8], 0 }
   0xa   :  { %18 = vsyncpa [#allocation8 + $0x1], 0  ;;  %s1821_s15 = smov 0   ;;  %s1823_s16 = smov 0  }
   0xb   :  { %s1825_s17 = smov 0   ;;  %s1827_s18 = smov 0  }
   0xc   :  { %s1829_s19 = smov 0   ;;  %s1831_s20 = smov 0  }
   0xd   :  { %s1833_s21 = smov 0   ;;  %s1835_s22 = smov 0  }
   0xe   :  { %s1837_s23 = smov 0   ;;  %s1839_s24 = smov 0  }
   0xf   :  { %s1841_s25 = smov 0  }
  0x10 LB: > { %2331 = sst [smem:[#allocation12_spill]] %s1761_s20  ;;  %s1335_s26 = sadd.s32 4294967295, %s1781_s25   ;;  %s1781_s25 = sphi %s1841_s25, %s24_s25   ;;  %s1777_s24 = sphi %s1839_s24, %s2366_s24   ;;  %s1773_s23 = sphi %s1837_s23, %s2365_s23   ;;  %s1769_s22 = sphi %s1835_s22, %s2364_s22   ;;  %s1765_s21 = sphi %s1833_s21, %s2363_s21   ;;  %s1761_s20 = sphi %s1831_s20, %s2362_s20   ;;  %s1757_s19 = sphi %s1829_s19, %s2371_s19   ;;  %s1753_s18 = sphi %s1827_s18, %s2370_s18   ;;  %s1749_s17 = sphi %s1825_s17, %s2369_s17   ;;  %s1745_s16 = sphi %s1823_s16, %s2368_s16   ;;  %s1741_s15 = sphi %s1821_s15, %s2367_s15  }
  0x11   : > { %2332 = sst [smem:[#allocation13_spill]] %s1773_s23  ;;  %s1336_s27 = sadd.s32 4294967294, %s1781_s25  }
  0x12   : > { %2333 = sst [smem:[#allocation14_spill]] %s1777_s24  ;;  %s33_s28 = sadd.s32 1, %s1773_s23 }
  0x13   : > { %s36_s29 = sadd.s32 1, %s1777_s24  ;;  %p34_p0 = scmp.ge.s32.totalorder %s33_s28, 2 }
  0x14   : > { %s1337_s30 = sshll.u32 %s1777_s24, 1  ;;  %s47_s6 = sadd.s32 1, %s1761_s20 }
  0x15   : > { %s1882_s5 = sadd.s32 %s1773_s23, %s1337_s30  ;;  %s2373_s28 = smov (%p34_p0, %s33_s28), 0 }
  0x16   : > { %2334 = sst [smem:[#allocation15_spill]] %s2373_s28  ;;  %s2375_s29 = smov (!%p34_p0, %s36_s29), %s1777_s24 }
  0x17   : > { %p54_p1 = scmp.ne.s32.totalorder %s1761_s20, %s1757_s19  ;;  %p55_p2 = scmp.eq.s32.totalorder %s1781_s25, 0 }
  0x18   : > { %p38_p3 = scmp.ge.s32.totalorder %s2375_s29, 2  ;;  %p60_p4 = scmp.ne.s32.totalorder %s1757_s19, %s1753_s18 }
  0x19   : > { %p1893_p5 = por %p55_p2, %p54_p1  ;;  %p61_p6 = scmp.eq.s32.totalorder %s1335_s26, 0 }
  0x1a   : > { %s2377_s29 = smov (%p38_p3, %s2375_s29), 0  ;;  %p1903_p8 = scmp.eq.s32.totalorder %s1335_s26, 3 }
  0x1b   : > { %2336 = sst [smem:[#allocation16_spill]] %s2377_s29  ;;  %p1899_p7 = por %p61_p6, %p60_p4 }
  0x1c   : > { %s1338_s10 = sshll.u32 %s2377_s29, 1  ;;  %p1908_p9 = scmp.eq.s32.totalorder %s1336_s27, 3 }
  0x1d   : > { %s43_s12 = sadd.s32 %s1338_s10, %s2373_s28  ;;  %p1915_p10 = por %p1903_p8, %p54_p1 }
  0x1e   : > { %s44_s14 = ssub.s32 %s1882_s5, %s43_s12  ;;  %p1922_p11 = por %p1908_p9, %p60_p4 }
  0x1f   : > { %s2340_s13 = scalar_select %p1915_p10, 1, 0 }
  0x20   : > { %s2341_s26 = scalar_select %p1922_p11, 1, 0 }
  0x21   : > { %p45_p12 = scmp.eq.s32.totalorder %s44_s14, 0  ;;  %s151_s27 = ssub.s32 %s1777_s24, %s2377_s29 }
  0x22   : > { %p152_p13 = scmp.eq.s32.totalorder %s151_s27, 0  ;;  %s154_s30 = sadd.s32 1, %s1749_s17 }
  0x23   : > { %s1930_s23 = scalar_select %p45_p12, %s1761_s20, %s47_s6  }
  0x24   : > { %s1933_s10 = scalar_select %p152_p13, %s1749_s17, %s154_s30  }
  0x25   : > { %2342 = sst [smem:[#allocation17_spill]] %s1930_s23  ;;  %p164_p0 = scmp.ne.s32.totalorder %s1749_s17, %s1745_s16 }
  0x26   : > { %p170_p1 = scmp.ne.s32.totalorder %s1745_s16, %s1741_s15  ;;  %p1495_p2 = scmp.lt.s32.totalorder %s1781_s25, 4 }
  0x27   : > { %p1942_p3 = por %p164_p0, %p1903_p8  ;;  %s194_s14 = sand.u32 1, %s1761_s20  }
  0x28   : > { %p1948_p4 = por %p170_p1, %p1908_p9  ;;  %s1346_s27 = sshll.u32 %s1882_s5, 6 }
  0x29   : > { %s2343_s12 = scalar_select %p1942_p3, 1, 0 }
  0x2a   : > { %s2344_s28 = scalar_select %p1948_p4, 1, 0 }
  0x2b   : > { %s1475_s29 = smul.u32 36, %s194_s14  ;;  %s2345_s0 = sld [smem:[#allocation18_spill]] }
  0x2c   : > { %p1961_p6 = pnand %p1495_p2, %p1893_p5  ;;  %s1968_s5 = scalar_lea.sflag [#allocation4], %s194_s14 }
  0x2d   : > { %s198_s11 = scalar_lea.vmem [#allocation3], %s1475_s29 }
  0x2e   : > { %s206_s23 = sshll.u32 %s198_s11, 4  ;;  %p1599_p12 = pneg %p1961_p6  ;;  %s1965_s23 = int_to_ptr.vmem [resolvable:$true] %s206_s23 }
  0x31   : > { %s1957_s30 = scalar_lea.hbm %s2345_s0, %s1346_s27  ;;  %s1602_s6 = scalar_lea.hbm %s2345_s0, 2304 }
  0x32   : > { %s1597_s24 = scalar_lea.hbm %s1957_s30, 576  ;;  %p1603_p0 = scmp.lt.u32.totalorder %s1957_s30, %s2345_s0 }
  0x33   : > { %p1598_p9 = scmp.ne.s32.totalorder %s1957_s30, %s1597_s24  ;;  %p1604_p1 = scmp.lt.u32.totalorder %s1602_s6, %s1597_s24 }
  0x34   : > { %p1606_p8 = scmp.lt.u32.totalorder %s1597_s24, %s1957_s30 }
  0x35   : > { %p1600_p13 = pnand %p1599_p12, %p1598_p9  ;;  %p1605_p2 = por %p1604_p1, %p1603_p0 }
  0x37   : > { %p1601_p5 = pneg %p1600_p13  ;;  %p1607_p4 = por %p1606_p8, %p1605_p2 }
  0x39   : > { %p1608_p11 = pnand %p1607_p4, %p1601_p5 }
  0x3b   : > { %1611 = shalt.err (!%p1608_p11)
}
  0x3c   : > { %s1612_s14 = scalar_lea.vmem %s1965_s23, 576  ;;  %s1783_s11 = smov [#allocation3]  }
  0x3d   : > { %p1613_p9 = scmp.ne.s32.totalorder %s1965_s23, %s1612_s14  ;;  %s1617_s7 = sshll.u32 %s1783_s11, 4  ;;  %s1618_s7 = int_to_ptr.vmem [resolvable:$false] %s1617_s7 }
  0x3e   : > { %s1619_s20 = scalar_lea.vmem %s1618_s7, 1152  ;;  %p1620_p10 = scmp.lt.s32.totalorder %s1965_s23, %s1618_s7 }
  0x3f   : > { %p1615_p13 = pnand %p1613_p9, %p1599_p12  ;;  %p1621_p0 = scmp.lt.s32.totalorder %s1619_s20, %s1612_s14 }
  0x41   : > { %p1616_p3 = pneg %p1615_p13  ;;  %p1622_p1 = por %p1621_p0, %p1620_p10 }
  0x43   : > { %p1623_p8 = pnand %p1622_p1, %p1616_p3 }
  0x45   : > { %1626 = shalt.err (!%p1623_p8)
}
  0x46   : > { %s1784_s24 = smov 256   ;;  %s1785_s27 = smov 64  }
  0x47   : > { %s1786_s6 = smov 4   ;;  %p225_p11 = scmp.lt.s32.totalorder %s1781_s25, 5 }
  0x48   : > { %1487 = dma.hbm_to_vmem [thread:$0]  (!%p1961_p6), %s1957_s30, 576, %s1965_s23, %s1968_s5, %s1784_s24, %s1785_s27, %s1786_s6  }
  0x49   : > { %p2347_p4 = scmp.ge.s32.totalorder %s1781_s25, 1 }
  0x4b   : > { %p226_p12 = pnand %p2347_p4, %p225_p11 }
  0x4c   : > { %s2000_s29 = sand.u32 (!%p226_p12), 1, %s1757_s19  }
  0x4d   : > { %229 = sbr.rel (%p226_p12) target bundleno = 565 (0x235), region = 32  ;;  %s232_s11 = scalar_lea.sflag (!%p226_p12), [#allocation4], %s2000_s29 }
  0x4e   : > { %s1476_s14 = smul.u32 (!%p226_p12), 36, %s2000_s29 }
  0x50   : > { %s2004_s7 = scalar_lea.vmem (!%p226_p12), [#allocation3], %s1476_s14 }
  0x54   : > { %1728 = dma.done.wait (%p1899_p7), %s232_s11, 576  }
  0x55   : > { %1730 = vsyncadd (%p1899_p7), %s232_s11, 4294966720  ;;  %s1477_s23 = smul.u32 12, %s2000_s29  ;;  %s268_s30 = sand.u32 1, %s1745_s16  }
  0x56   : > { %s2014_s9 = sshll.u32 %s268_s30, 2  ;;  %s1349_s5 = sshll.u32 %s1769_s22, 1 }
  0x57   : > { %s2018_s20 = sadd.s32 %s1765_s21, %s1349_s5  ;;  %s2348_s1 = sld [smem:[#allocation19_spill]] }
  0x58   : > { %p275_p10 = scmp.lt.s32.totalorder %s2018_s20, 3  ;;  %s2025_s11 = scalar_lea.vmem [#allocation6], %s1477_s23 }
  0x59   : > { %s270_s0 = scalar_lea.vmem [#allocation7], %s2014_s9  ;;  %p1351_p7 = scmp.ne.s32.totalorder %s1765_s21, 0 }
  0x5a   : > { %s276_s24 = scalar_select %p275_p10, %s2018_s20, 3 }
  0x5b   : > { %286 = sbr.rel (%p1351_p7) target bundleno = 98 (0x62), region = 40  ;;  %vm287_vm0 = vcmask (!%p1351_p7), 60416   ;;  %v1787_v0 = vmov (!%p1351_p7), 0.0  }
  0x5c   : > { %s1350_s8 = sshll.u32 %s276_s24, 1  ;;  %288 = vst.msk [vmem:[#allocation2] sm:$0xf] (!%p1351_p7), %vm287_vm0, %v1787_v0 }
  0x5d   : > { %s278_s14 = scalar_lea.vmem %s2348_s1, %s1350_s8 }
  0x62 PF: > { %v2029_v1 = vld [vmem:[%s278_s14] sm:$0x3]  ;;  %v2032_v2 = vld [vmem:[%s2004_s7 + $0x10] sm:$0xf]  ;;  %v315_v3 = vlaneseq  ;;  %v1788_v4 = vmov 0.0   ;;  %v1789_v6 = vmov 0  }
  0x63   : > { %1415 = vmatprep.subr.mxu1 %v1788_v4  ;;  %1435 = vmatprep.subr.mxu0 %v1788_v4  ;;  %vm290_vm1 = vcmp.ge.s32.totalorder %v2029_v1, 1  ;;  %vm291_vm2 = vcmp.lt.s32.totalorder %v2029_v1, 15  ;;  %v309_v5 = vld [vmem:[%s2004_s7] sm:$0xf]  ;;  %vm328_vm3 = vcmask 1043456   ;;  %vm1790_vm4 = vmmov 0  }
  0x64   : > { %v292_v7 = vsel %vm290_vm1, 1, %v1789_v6  ;;  %v313_v8 = vadd.f32 %v2032_v2, %v309_v5  ;;  %v2043_v9 = vshrl.u32 %v315_v3, 7  ;;  %v1360_v10 = vld [vmem:[%s2004_s7 + $0x4] sm:$0xf]  ;;  %1417 = vmatprep.mubr.msk.f32.mxu1 %vm1790_vm4, %v1788_v4  ;;  %1437 = vmatprep.mubr.msk.f32.mxu0 %vm1790_vm4, %v1788_v4  ;;  %v323_v12 = vmax.f32 %v309_v5, 0.0  ;;  %s2351_s2 = sld [smem:[#allocation20_spill]] }
  0x65   : > { %v310_v11 = vrot.slane %v292_v7, 1  ;;  %v2053_v13 = vsel %vm291_vm2, 1, %v1789_v6  ;;  %v2056_v14 = vld [vmem:[%s2004_s7 + $0x8] sm:$0xf]  ;;  %vm324_vm5 = vcmask 31744   ;;  %v308_v31 = vmax.f32 %v2032_v2, 0.0 }
  0x66   : > { %v2059_v15 = vsub.s32 0, %v2043_v9  ;;  %v480_v16 = vadd.f32 %v1360_v10, %v313_v8  ;;  %v570_v17 = vrot.slane %v2053_v13, 1  ;;  %v1368_v18 = vld [vmem:[%s2004_s7 + $0xc] sm:$0xf]  ;;  %v667_v19 = vsub.s32 1, %v2043_v9  ;;  %1416 = vmatpush3.msk.msra.mxu1 %vm328_vm3, %v323_v12  ;;  %p1390_p3 = scmp.ne.s32.totalorder %s1765_s21, 1 }
  0x67   : > { %vm2064_vm6 = vcmp.ne.s32.totalorder %v310_v11, 0  ;;  %v674_v21 = vmax.f32 %v1368_v18, 0.0  ;;  %v2070_v22 = vld [vmem:[%s2004_s7 + $0x14] sm:$0xf]  ;;  %1420 = vmatprep.subr.mxu1 %v1788_v4  ;;  %v2117_v37 = vld [vmem:[%s2004_s7 + $0x18] sm:$0xf] }
  0x68   : > { %vm312_vm7 = vmand %vm290_vm1, %vm2064_vm6  ;;  %v484_v24 = vrot.slane %v292_v7, %v2059_v15  ;;  %vm2080_vm8 = vcmp.ne.s32.totalorder %v570_v17, 0  ;;  %v573_v26 = vadd.f32 %v2056_v14, %v480_v16  ;;  %v668_v29 = vrot.slane %v292_v7, %v667_v19  ;;  %v1380_v50 = vld [vmem:[%s2004_s7 + $0x1c] sm:$0xf]  ;;  %v1384_v55 = vld [vmem:[%s2004_s7 + $0x20] sm:$0xf] }
  0x69   : > { %v314_v28 = vsel %vm312_vm7, 1, %v1789_v6  ;;  %vm572_vm9 = vmand %vm290_vm1, %vm2080_vm8  ;;  %1436 = vmatpush3.msk.msra.mxu0 %vm328_vm3, %v674_v21  ;;  %v764_v30 = vmax.f32 %v2070_v22, 0.0  ;;  %v490_v41 = vmax.f32 %v1360_v10, 0.0  ;;  %v856_v45 = vmax.f32 %v2117_v37, 0.0 }
  0x6a   : > { %v322_v23 = vld [vmem:[%s2351_s2] sm:$0xf]  ;;  %v1369_v27 = vld [vmem:[%s2351_s2 + $0xc] sm:$0xf]  ;;  %v318_v32 = vrot.slane %v314_v28, %v2059_v15  ;;  %vm2103_vm10 = vcmp.eq.s32.totalorder %v484_v24, 1  ;;  %v574_v34 = vsel %vm572_vm9, 1, %v1789_v6  ;;  %v664_v35 = vadd.f32 %v1368_v18, %v573_v26  ;;  %1440 = vmatprep.subr.mxu0 %v1788_v4  ;;  %vm844_vm14 = vmand %vm291_vm2, %vm2064_vm6 }
  0x6b   : > { %1418 = vmatmul.mubr.msk.f32.vlgmr.msra.gmra.mrb[0].mxu1 %vm324_vm5, %v322_v23  ;;  %1438 = vmatmul.mubr.msk.f32.vlgmr.msra.gmra.mrb[0].mxu0 %vm324_vm5, %v1369_v27  ;;  %v578_v36 = vrot.slane %v574_v34, %v2059_v15  ;;  %v486_v39 = vsel %vm2103_vm10, %v1360_v10, -inf  ;;  %v1355_v40 = vld [vmem:[%s2351_s2 + $0x10] sm:$0xf]  ;;  %vm669_vm13 = vcmp.eq.s32.totalorder %v668_v29, 1  ;;  %v1373_v44 = vld [vmem:[%s2351_s2 + $0x14] sm:$0xf]  ;;  %v940_v9 = vrot.slane %v2053_v13, %v2059_v15 }
  0x6c   : > { %1422 = vmatprep.mubr.msk.f32.mxu1 %vm1790_vm4, %v1788_v4  ;;  %1441 = vmatpush3.msk.msra.mxu0 %vm328_vm3, %v764_v30  ;;  %vm319_vm11 = vcmp.eq.s32.totalorder %v318_v32, 1  ;;  %v670_v47 = vsel %vm669_vm13, %v1368_v18, -inf  ;;  %v1361_v51 = vld [vmem:[%s2351_s2 + $0x4] sm:$0xf]  ;;  %v584_v52 = vmax.f32 %v2056_v14, 0.0  ;;  %v946_v54 = vmax.f32 %v1380_v50, 0.0 }
  0x6d   : > { %1421 = vmatpush3.msk.msra.mxu1 %vm328_vm3, %v308_v31  ;;  %1442 = vmatprep.mubr.msk.f32.mxu0 %vm1790_vm4, %v1788_v4  ;;  %v320_v38 = vsel %vm319_vm11, %v309_v5, -inf  ;;  %vm579_vm12 = vcmp.eq.s32.totalorder %v578_v36, 1  ;;  %v1377_v53 = vld [vmem:[%s2351_s2 + $0x18] sm:$0xf]  ;;  %v1365_v56 = vld [vmem:[%s2351_s2 + $0x8] sm:$0xf]  ;;  %v754_v3 = vadd.f32 %v2070_v22, %v664_v35  ;;  %v758_v5 = vrot.slane %v2053_v13, %v667_v19 }
  0x6e   : > { %1445 = vmatprep.subr.mxu0 %v1788_v4  ;;  %1425 = vmatprep.subr.mxu1 %v1788_v4  ;;  %v321_v42 = vmax.f32 %v2032_v2, %v320_v38  ;;  %v580_v43 = vsel %vm579_vm12, %v2056_v14, -inf  ;;  %v1381_v57 = vld [vmem:[%s2351_s2 + $0x1c] sm:$0xf]  ;;  %v1038_v58 = vmax.f32 %v1384_v55, 0.0  ;;  %v1385_v59 = vld [vmem:[%s2351_s2 + $0x20] sm:$0xf] }
  0x6f   : > { %v1352_v60 = vsel %vm290_vm1, 1.0, %v1788_v4  ;;  %v1353_v61 = vsel %vm291_vm2, 1.0, %v1788_v4  ;;  %v846_v7 = vsel %vm844_vm14, 1, %v1789_v6  ;;  %vm759_vm15 = vcmp.eq.s32.totalorder %v758_v5, 1  ;;  %vm1026_vm1 = vmand %vm291_vm2, %vm2080_vm8 }
  0x70   : > { %v487_v46 = vmax.f32 %v321_v42, %v486_v39  ;;  %v296_v62 = vadd.f32 %v1353_v61, %v1352_v60  ;;  %v850_v8 = vrot.slane %v846_v7, %v2059_v15  ;;  %v760_v10 = vsel %vm759_vm15, %v2070_v22, -inf }
  0x71   : > { %v1028_v17 = vsel %vm1026_vm1, 1, %v1789_v6  ;;  %vm1148_vm2 = vcmask 7168   ;;  %vm1150_vm7 = vcmask 15360   ;;  %vm1152_vm8 = vcmask 23552  }
  0x72   : > { %v581_v48 = vmax.f32 %v487_v46, %v580_v43  ;;  %v297_v63 = vadd.f32 1.0, %v296_v62  ;;  %vm851_vm0 = vcmp.eq.s32.totalorder %v850_v8, 1  ;;  %v1032_v22 = vrot.slane %v1028_v17, %v2059_v15 }
  0x73   : > { %1423 = vmatmul.mubr.msk.f32.vlgmr.msra.gmra.mrb[0].mxu1 %vm324_vm5, %v1355_v40  ;;  %1443 = vmatmul.mubr.msk.f32.vlgmr.msra.gmra.mrb[0].mxu0 %vm324_vm5, %v1373_v44  ;;  %v852_v16 = vsel %vm851_vm0, %v2117_v37, -inf  ;;  %vm1155_vm9 = vcmask 39936   ;;  %vm1157_vm10 = vcmask 48128   ;;  %vm1159_vm11 = vcmask 56320  }
  0x74   : > { %1426 = vmatpush3.msk.msra.mxu1 %vm328_vm3, %v490_v41  ;;  %1427 = vmatprep.mubr.msk.f32.mxu1 %vm1790_vm4, %v1788_v4  ;;  %v671_v49 = vmax.f32 %v581_v48, %v670_v47  ;;  %v299_v0 = vrot.slane %v297_v63, 1  ;;  %vm1033_vm6 = vcmp.eq.s32.totalorder %v1032_v22, 1  ;;  %v1147_v47 = vld [vmem:[#allocation2] sm:$0xf] }
  0x75   : > { %1430 = vmatprep.subr.mxu1 %v1788_v4  ;;  %1446 = vmatpush3.msk.msra.mxu0 %vm328_vm3, %v856_v45  ;;  %v1034_v24 = vsel %vm1033_vm6, %v1384_v55, -inf }
  0x76   : > { %1447 = vmatprep.mubr.msk.f32.mxu0 %vm1790_vm4, %v1788_v4  ;;  %1450 = vmatprep.subr.mxu0 %v1788_v4  ;;  %v301_v2 = vmul.f32 %v299_v0, %v297_v63  ;;  %v761_v12 = vmax.f32 %v671_v49, %v760_v10 }
  0x78   : > { %1595 = vrcp.f32 %v301_v2  ;;  %v853_v20 = vmax.f32 %v761_v12, %v852_v16 }
  0x7b   : > { %1428 = vmatmul.mubr.msk.f32.vlgmr.msra.gmra.mrb[0].mxu1 %vm324_vm5, %v1361_v51  ;;  %1448 = vmatmul.mubr.msk.f32.vlgmr.msra.gmra.mrb[0].mxu0 %vm324_vm5, %v1377_v53 }
  0x7c   : > { %1431 = vmatpush3.msk.msra.mxu1 %vm328_vm3, %v584_v52  ;;  %1432 = vmatprep.mubr.msk.f32.mxu1 %vm1790_vm4, %v1788_v4 }
  0x7d   : > { %1451 = vmatpush3.msk.msra.mxu0 %vm328_vm3, %v946_v54  ;;  %1452 = vmatprep.mubr.msk.f32.mxu0 %vm1790_vm4, %v1788_v4 }
  0x7e   : > { %1455 = vmatprep.subr.mxu0 %v1788_v4 }
  0x82   : > { %v1596_v14 = vpop.eup %1595 }
  0x83   : > { %1433 = vmatmul.mubr.msk.f32.vlgmr.msra.gmra.mrb[0].mxu1 %vm324_vm5, %v1365_v56  ;;  %1453 = vmatmul.mubr.msk.f32.vlgmr.msra.gmra.mrb[0].mxu0 %vm324_vm5, %v1381_v57  ;;  %v1119_v19 = vrot.slane %v1596_v14, %v2059_v15 }
  0x84   : > { %1456 = vmatpush3.msk.msra.mxu0 %vm328_vm3, %v1038_v58  ;;  %1457 = vmatprep.mubr.msk.f32.mxu0 %vm1790_vm4, %v1788_v4  ;;  %v845_v4 = vadd.f32 %v2117_v37, %v754_v3  ;;  %vm941_vm4 = vcmp.eq.s32.totalorder %v940_v9, 1 }
  0x85   : > { %v942_v21 = vsel %vm941_vm4, %v1380_v50, -inf }
  0x86   : > { %v936_v11 = vadd.f32 %v1380_v50, %v845_v4  ;;  %v943_v23 = vmax.f32 %v853_v20, %v942_v21 }
  0x88   : > { %v1027_v18 = vadd.f32 %v1384_v55, %v936_v11  ;;  %v1035_v6 = vmax.f32 %v943_v23, %v1034_v24 }
  0x8a   : > { %v1120_v13 = vmul.f32 %v1119_v19, %v1027_v18  ;;  %v1133_v27 = vsel %vm328_vm3, %v1035_v6, 0.0  ;;  %1388 = vst [vmem:[%s2025_s11 + $0x4] sm:$0xf] %v1035_v6  ;;  %v1136_v28 = vmul.f32 %v1035_v6, %v1035_v6 }
  0x8b   : > { %1458 = vmatmul.mubr.msk.f32.vlgmr.msra.gmra.mrb[0].mxu0 %vm324_vm5, %v1385_v59  ;;  %1134 = vadd.xlane.f32.xlu1 %v1133_v27 }
  0x8c   : > { %v1126_v1 = vsel %vm328_vm3, %v1120_v13, 0.0  ;;  %1121 = vst [vmem:[%s2025_s11] sm:$0xf] %v1120_v13  ;;  %v1129_v25 = vmul.f32 %v1120_v13, %v1120_v13  ;;  %v1137_v15 = vsel %vm328_vm3, %v1136_v28, 0.0 }
  0x8d   : > { %1127 = vadd.xlane.f32.xlu0 %v1126_v1 }
  0x8e   : > { %v1130_v26 = vsel %vm328_vm3, %v1129_v25, 0.0 }
  0x8f   : > { %1138 = vadd.xlane.f32.xlu1 %v1137_v15 }
  0x91   : > { %1131 = vadd.xlane.f32.xlu0 %v1130_v26 }
 0x118   : > { %v1135_v38 = vpop.xlane.xlu1 %1134 }
 0x11a   : > { %v1128_v37 = vpop.xlane.xlu0 %1127 }
 0x11c   : > { %v1139_v42 = vpop.xlane.xlu1 %1138 }
 0x11e   : > { %v1132_v39 = vpop.xlane.xlu0 %1131 }
 0x11f   : > { %v1149_v40 = vsel %vm1148_vm2, %v1128_v37, %v1132_v39 }
 0x120   : > { %v1151_v41 = vsel %vm1150_vm7, %v1149_v40, %v1135_v38 }
 0x121   : > { %v1153_v43 = vsel %vm1152_vm8, %v1151_v41, %v1139_v42 }
 0x156   : > { %v657_v29 = vpop.f32.mrb[0].mxu1 }
 0x157   : > { %v1434_v30 = vpop.f32.mrb[1].mxu1 }
 0x15e   : > { %v1111_v31 = vpop.f32.mrb[0].mxu0 }
 0x15f   : > { %v1460_v32 = vadd.f32 %v1111_v31, %v657_v29  ;;  %v1459_v33 = vpop.f32.mrb[1].mxu0 }
 0x161   : > { %1389 = vst [vmem:[%s2025_s11 + $0x8] sm:$0xf] %v1460_v32  ;;  %v1140_v34 = vsel %vm328_vm3, %v1460_v32, 0.0  ;;  %v1143_v35 = vmul.f32 %v1460_v32, %v1460_v32 }
 0x162   : > { %1141 = vadd.xlane.f32.xlu0 %v1140_v34 }
 0x163   : > { %v1144_v36 = vsel %vm328_vm3, %v1143_v35, 0.0  ;;  %vm1162_vm3 = vcmask 60416  }
 0x164   : > { %1145 = vadd.xlane.f32.xlu1 %v1144_v36 }
 0x1ef   : > { %v1142_v44 = vpop.xlane.xlu0 %1141 }
 0x1f0   : > { %v1154_v45 = vsel %vm324_vm5, %v1153_v43, %v1142_v44 }
 0x1f1   : > { %v1146_v46 = vpop.xlane.xlu1 %1145  ;;  %1167 = sbr.rel (%p1390_p3) target bundleno = 512 (0x200), region = 44 }
 0x1f2   : > { %v1156_v48 = vsel %vm1155_vm9, %v1154_v45, %v1146_v46 }
 0x1f3   : > { %v1158_v49 = vsel %vm1157_vm10, %v1156_v48, 0.0 }
 0x1f4   : > { %v1160_v50 = vsel %vm1159_vm11, %v1158_v49, 0.0 }
 0x1f5   : > { %v1161_v51 = vadd.f32 %v1160_v50, %v1147_v47 }
 0x1f7   : > { %1163 = vst.msk [vmem:[#allocation2] sm:$0xf] %vm1162_vm3, %v1161_v51 }
 0x1fe   : > { %v1168_v52 = vld [vmem:[#allocation2] sm:$0xf] }
 0x1ff   : > { %1169 = vst.msk [vmem:[%s270_s0] sm:$0xf] %vm1162_vm3, %v1168_v52 }
 0x200 PF: > { %s1393_s8 = sshll.u32 %s2018_s20, 6  ;;  %s2356_s3 = sld [smem:[#allocation21_spill]] }
 0x201   : > { %s1190_s23 = sshll.u32 %s2025_s11, 4  ;;  %s1171_s21 = scalar_lea.sflag [#allocation5], %s2000_s29  ;;  %s2222_s23 = int_to_ptr.vmem [resolvable:$true] %s1190_s23 }
 0x202   : > { %s1627_s5 = scalar_lea.vmem %s2222_s23, 192  ;;  %p2357_p5 = scmp.ne.s32.totalorder %s2340_s13, 0 }
 0x203   : > { %p1628_p6 = scmp.ne.s32.totalorder %s2222_s23, %s1627_s5  ;;  %s1791_s24 = smov [#allocation6]  }
 0x204   : > { %s1631_s7 = sshll.u32 %s1791_s24, 4  ;;  %s1632_s7 = int_to_ptr.vmem [resolvable:$false] %s1631_s7 }
 0x205   : > { %p1629_p2 = pnand %p1628_p6, %p2357_p5  ;;  %s1633_s20 = scalar_lea.vmem %s1632_s7, 384 }
 0x206   : > { %s2219_s14 = scalar_lea.hbm %s2356_s3, %s1393_s8  ;;  %p1634_p13 = scmp.lt.s32.totalorder %s2222_s23, %s1632_s7 }
 0x207   : > { %p1630_p9 = pneg %p1629_p2  ;;  %p1635_p0 = scmp.lt.s32.totalorder %s1633_s20, %s1627_s5 }
 0x209   : > { %p1636_p1 = por %p1635_p0, %p1634_p13 }
 0x20b   : > { %p1637_p8 = pnand %p1636_p1, %p1630_p9 }
 0x20d   : > { %1640 = shalt.err (!%p1637_p8)
}
 0x20e   : > { %s1641_s11 = scalar_lea.hbm %s2219_s14, 192  ;;  %s1645_s6 = scalar_lea.hbm %s2356_s3, 768 }
 0x20f   : > { %p1642_p11 = scmp.ne.s32.totalorder %s2219_s14, %s1641_s11  ;;  %p1646_p10 = scmp.lt.u32.totalorder %s2219_s14, %s2356_s3 }
 0x210   : > { %p1647_p7 = scmp.lt.u32.totalorder %s1645_s6, %s1641_s11  ;;  %p1649_p6 = scmp.lt.u32.totalorder %s1641_s11, %s2219_s14 }
 0x211   : > { %p1643_p4 = pnand %p1642_p11, %p2357_p5 }
 0x212   : > { %p1648_p3 = por %p1647_p7, %p1646_p10 }
 0x213   : > { %p1644_p12 = pneg %p1643_p4 }
 0x214   : > { %p1650_p2 = por %p1649_p6, %p1648_p3 }
 0x216   : > { %p1651_p9 = pnand %p1650_p2, %p1644_p12 }
 0x218   : > { %1654 = shalt.err (!%p1651_p9)
}
 0x219   : > { %s1792_s5 = smov 64   ;;  %s1793_s20 = smov 256  }
 0x21a   : > { %s1794_s8 = smov 4   ;;  %s1394_s27 = sshll.u32 %s1769_s22, 6 }
 0x21b   : > { %1480 = dma.vmem_to_hbm [thread:$0]  (%p2357_p5), %s2222_s23, 192, %s2219_s14, %s1171_s21, %s1792_s5, %s1793_s20, %s1794_s8  }
 0x21c   : > { %s2252_s24 = scalar_lea.hbm %s2319_s4, %s1394_s27  ;;  %s1206_s7 = sshll.u32 %s270_s0, 4  ;;  %s1207_s7 = int_to_ptr.vmem [resolvable:$true] %s1206_s7 }
 0x21d   : > { %s1176_s1 = scalar_lea.sflag [#allocation8], %s268_s30  ;;  %s1655_s2 = scalar_lea.vmem %s1207_s7, 64 }
 0x21e   : > { %p1656_p13 = scmp.ne.s32.totalorder %s1207_s7, %s1655_s2  ;;  %p2358_p0 = scmp.ne.s32.totalorder %s2343_s12, 0 }
 0x21f   : > { %s1795_s3 = smov [#allocation7]  }
 0x220   : > { %p1657_p1 = pnand %p1656_p13, %p2358_p0  ;;  %s1659_s13 = sshll.u32 %s1795_s3, 4  ;;  %s1660_s13 = int_to_ptr.vmem [resolvable:$false] %s1659_s13 }
 0x221   : > { %s1661_s29 = scalar_lea.vmem %s1660_s13, 128  ;;  %p1662_p5 = scmp.lt.s32.totalorder %s1207_s7, %s1660_s13 }
 0x222   : > { %p1658_p8 = pneg %p1657_p1  ;;  %p1663_p11 = scmp.lt.s32.totalorder %s1661_s29, %s1655_s2 }
 0x224   : > { %p1664_p4 = por %p1663_p11, %p1662_p5 }
 0x226   : > { %p1665_p12 = pnand %p1664_p4, %p1658_p8 }
 0x228   : > { %1668 = shalt.err (!%p1665_p12)
}
 0x229   : > { %s1669_s0 = scalar_lea.hbm %s2252_s24, 64  ;;  %s1673_s3 = scalar_lea.hbm %s2319_s4, 128 }
 0x22a   : > { %p1670_p10 = scmp.ne.s32.totalorder %s2252_s24, %s1669_s0  ;;  %p1674_p6 = scmp.lt.u32.totalorder %s2252_s24, %s2319_s4 }
 0x22b   : > { %p1675_p2 = scmp.lt.u32.totalorder %s1673_s3, %s1669_s0  ;;  %p1677_p13 = scmp.lt.u32.totalorder %s1669_s0, %s2252_s24 }
 0x22c   : > { %p1671_p7 = pnand %p1670_p10, %p2358_p0 }
 0x22d   : > { %p1676_p9 = por %p1675_p2, %p1674_p6 }
 0x22e   : > { %p1672_p3 = pneg %p1671_p7 }
 0x22f   : > { %p1678_p1 = por %p1677_p13, %p1676_p9 }
 0x231   : > { %p1679_p8 = pnand %p1678_p1, %p1672_p3 }
 0x233   : > { %1682 = shalt.err (!%p1679_p8)
}
 0x234   : > { %1481 = dma.vmem_to_hbm [thread:$0]  (%p2358_p0), %s1207_s7, 64, %s2252_s24, %s1176_s1  }
 0x235 PF: > { %p1496_p5 = scmp.ge.s32.totalorder %s1781_s25, 2  ;;  %s1218_s2 = sand.u32 1, %s1753_s18  }
 0x236   : > { %p2359_p11 = scmp.ne.s32.totalorder %s2341_s26, 0  ;;  %s1219_s23 = scalar_lea.sflag [#allocation5], %s1218_s2 }
 0x238   : > { %p1489_p4 = pnand %p1496_p5, %p2359_p11 }
 0x23a   : > { %1732 = dma.done.wait (!%p1489_p4), %s1219_s23, 192  }
 0x23b   : > { %1734 = vsyncadd (!%p1489_p4), %s1219_s23, 4294967104  ;;  %s1227_s21 = sand.u32 1, %s1741_s15   ;;  %p2360_p12 = scmp.ne.s32.totalorder %s2344_s28, 0 }
 0x23c   : > { %s1228_s5 = scalar_lea.sflag [#allocation8], %s1227_s21 }
 0x23d   : > { %p1492_p10 = pnand %p1496_p5, %p2360_p12 }
 0x23f   : > { %1736 = dma.done.wait (!%p1492_p10), %s1228_s5, 64  }
 0x240   : > { %1738 = vsyncadd (!%p1492_p10), %s1228_s5, 4294967232  ;;  %s24_s25 = sadd.s32 1, %s1781_s25   ;;  %s2361_s1 = sld [smem:[#allocation12_spill]] }
 0x241   : > { %p21_p0 = scmp.ge.s32.totalorder %s24_s25, 6   ;;  %s2362_s20 = sld [smem:[#allocation17_spill]] }
 0x242   : > { %s2363_s21 = sld [smem:[#allocation13_spill]]  ;;  %s2364_s22 = sld [smem:[#allocation14_spill]] }
 0x243   : > { %s2365_s23 = sld [smem:[#allocation15_spill]]  ;;  %s2366_s24 = sld [smem:[#allocation16_spill]] }
 0x244   : > { %s2367_s15 = smov %s1745_s16  ;;  %s2368_s16 = smov %s1749_s17 }
 0x245   : > { %s2369_s17 = smov %s1933_s10  ;;  %s2370_s18 = smov %s1757_s19 }
 0x246   : > { %s2371_s19 = smov %s2361_s1  ;;  %23 = sbr.rel (!%p21_p0) target bundleno = 16 (0x10), region = 123 }
 0x24d   :  { %1233 = vsyncpa [#allocation4], 1 }
 0x24e   :  { %1235 = vsyncpa [#allocation4 + $0x1], 1 }
 0x24f   :  { %1236 = vsyncpa [#allocation5], 1 }
 0x250   :  { %1238 = vsyncpa [#allocation5 + $0x1], 1 }
 0x251   :  { %1239 = vsyncpa [#allocation8], 1 }
 0x252   :  { %1241 = vsyncpa [#allocation8 + $0x1], 1 }

</bundles_post_ra>
